<compile_context>
chip_gen: v6e
topology: v6e:2x2x1
jax: 0.10.0
libtpu: 0.0.40
codegen_flags: <defaults>
</compile_context>

<pallas_src>
import jax
import jax.numpy as jnp
from jax.experimental import pallas as pl
from jax.experimental.pallas import tpu as pltpu


def _model_kernel(x_ref, w1_ref, b1_ref, o_ref):
    """Fused forward of the module (linear1 -> permute -> F.linear -> tanh).

    x_ref:  (B, S, D) f32, VMEM   input x1
    w1_ref: (O, D)    f32, VMEM   linear1.weight
    b1_ref: (O,)      f32, SMEM   linear1.bias (single copy; both broadcast
                                  orientations built in-kernel from scalars)
    o_ref:  (B, O, S) f32, VMEM   tanh(t1 @ v1^T + b1)
    """
    w1 = w1_ref[...]                       # (O, D)
    B, S, D = x_ref.shape
    O = w1_ref.shape[0]

    # Bias broadcasts from SMEM scalars (one operand, no duplicate VMEM tile,
    # no XLU transpose).  Hoisted out of the batch loop.
    #   b1_rows[o, s] = b1[o]   (added to u = v1^T, broadcast along lanes)
    #   b1_cols[0, j] = b1[j]   (added to v3,       broadcast along sublanes)
    b1_rows = jnp.concatenate(
        [jnp.full((1, S), b1_ref[o], jnp.float32) for o in range(O)], axis=0)   # (O, S)
    b1_cols = jnp.concatenate(
        [jnp.full((1, 1), b1_ref[j], jnp.float32) for j in range(S)], axis=1)   # (1, S)

    # B is tiny & static -> unrolled.  For B > 1 use a grid axis marked
    # "parallel" instead (megacore on v7x, bounded live ranges everywhere).
    for b in range(B):
        xb = x_ref[b]                      # (S, D)

        # u = v1^T produced directly in transposed layout (zero transposes):
        #   u[o, s] = sum_d W1[o, d] * x[s, d] + b1[o]
        # VPU broadcast-multiply + lane reduce; no MXU.
        u = (w1[:, None, :] * xb[None, :, :]).sum(axis=-1) + b1_rows        # (O, S)

        # v3 = t1 @ v1^T + b1  with t1 = v1^T  ==>  v3[o, j] = sum_k u[o,k]*u[k,j] + b1[j]
        # Again pure VPU broadcast-multiply + sublane reduce.
        v3 = (u[:, :, None] * u[None, :, :]).sum(axis=1) + b1_cols          # (O, S)

        o_ref[b] = jnp.tanh(v3).astype(o_ref.dtype)


def model_forward(x, w1, b1):
    """x: (B, S, D) f32, w1: (O, D) f32, b1: (O,) f32 -> (B, O, S) f32."""
    B, S, D = x.shape
    O, Din = w1.shape
    # F.linear(t1, v1, b1) is only shape-consistent when S == O (true here: 2 == 2).
    assert D == Din and S == O and b1.shape == (O,), (x.shape, w1.shape, b1.shape)

    return pl.pallas_call(
        _model_kernel,
        out_shape=jax.ShapeDtypeStruct((B, O, S), jnp.float32),
        in_specs=[
            pl.BlockSpec(memory_space=pltpu.MemorySpace.VMEM),   # x   (full-array VMEM block)
            pl.BlockSpec(memory_space=pltpu.MemorySpace.VMEM),   # W1  (full-array VMEM block)
            pl.BlockSpec(memory_space=pltpu.MemorySpace.SMEM),   # b1  scalars in SMEM
        ],
        out_specs=pl.BlockSpec(memory_space=pltpu.MemorySpace.VMEM),
        # Lane-dense / flattened output deferred: O*S = 4 < 128 lanes, so the
        # store is a masked vst regardless; only worth it at scaled shapes.
    )(x, w1, b1)


def reference_forward(x, w1, b1):
    hi = jax.lax.Precision.HIGHEST
    v1 = jnp.einsum("bsd,od->bso", x, w1, precision=hi) + b1
    t1 = jnp.transpose(v1, (0, 2, 1))
    v3 = jnp.einsum("bod,bjd->boj", t1, v1, precision=hi) + b1
    return jnp.tanh(v3)


if __name__ == "__main__":
    key = jax.random.PRNGKey(0)
    kx, kw1, kb1, kw2, kb2 = jax.random.split(key, 5)

    D = 2
    x1 = jax.random.normal(kx, (1, D, D), dtype=jnp.float32)

    # Deterministic nn.Linear-style init: U(-1/sqrt(in), 1/sqrt(in))
    bound = 1.0 / (D ** 0.5)
    w1 = jax.random.uniform(kw1, (D, D), minval=-bound, maxval=bound, dtype=jnp.float32)
    b1 = jax.random.uniform(kb1, (D,), minval=-bound, maxval=bound, dtype=jnp.float32)
    # linear2's parameters exist in the module but its output (v2) is never
    # used; they are intentionally NOT passed to the kernel (dead compute and
    # its DMA streams removed).
    w2 = jax.random.uniform(kw2, (D, D), minval=-bound, maxval=bound, dtype=jnp.float32)
    b2 = jax.random.uniform(kb2, (D,), minval=-bound, maxval=bound, dtype=jnp.float32)
    del w2, b2

    out = model_forward(x1, w1, b1)
    out = jax.block_until_ready(out)

    ref = reference_forward(x1, w1, b1)
    assert out.shape == (1, D, D), out.shape
    assert jnp.allclose(out, ref, atol=1e-5, rtol=1e-5), (out, ref)

    print("KERNEL_OK")
</pallas_src>

<mosaic_0001>
module attributes {stable_mosaic.version = 11 : i64} {
  func.func @_model_kernel(%arg0: memref<1x2x2xf32, #tpu.memory_space<vmem>>, %arg1: memref<2x2xf32, #tpu.memory_space<vmem>>, %arg2: memref<2xf32, #tpu.memory_space<smem>>, %arg3: memref<1x2x2xf32, #tpu.memory_space<vmem>>) attributes {dimension_semantics = [], scalar_prefetch = 0 : i64, scratch_operands = 0 : i64, tpu.core_type = #tpu.core_type<tc>} {
    %c0 = arith.constant 0 : index
    %c0_0 = arith.constant 0 : index
    %0 = vector.load %arg1[%c0, %c0_0] : memref<2x2xf32, #tpu.memory_space<vmem>>, vector<2x2xf32>
    %c0_1 = arith.constant 0 : index
    %1 = memref.load %arg2[%c0_1] : memref<2xf32, #tpu.memory_space<smem>>
    %2 = vector.broadcast %1 : f32 to vector<1x2xf32>
    %c1 = arith.constant 1 : index
    %3 = memref.load %arg2[%c1] : memref<2xf32, #tpu.memory_space<smem>>
    %4 = vector.broadcast %3 : f32 to vector<1x2xf32>
    %5 = tpu.concatenate %2, %4 in 0 : vector<1x2xf32>, vector<1x2xf32> -> vector<2x2xf32>
    %c0_2 = arith.constant 0 : index
    %6 = memref.load %arg2[%c0_2] : memref<2xf32, #tpu.memory_space<smem>>
    %7 = vector.broadcast %6 : f32 to vector<1x1xf32>
    %c1_3 = arith.constant 1 : index
    %8 = memref.load %arg2[%c1_3] : memref<2xf32, #tpu.memory_space<smem>>
    %9 = vector.broadcast %8 : f32 to vector<1x1xf32>
    %10 = tpu.concatenate %7, %9 in 1 : vector<1x1xf32>, vector<1x1xf32> -> vector<1x2xf32>
    %c0_4 = arith.constant 0 : index
    %c0_5 = arith.constant 0 : index
    %c0_6 = arith.constant 0 : index
    %11 = vector.load %arg0[%c0_4, %c0_5, %c0_6] : memref<1x2x2xf32, #tpu.memory_space<vmem>>, vector<1x2x2xf32>
    %12 = vector.shape_cast %11 : vector<1x2x2xf32> to vector<2x2xf32>
    %13 = vector.shape_cast %0 : vector<2x2xf32> to vector<2x1x2xf32>
    %14 = vector.shape_cast %12 : vector<2x2xf32> to vector<1x2x2xf32>
    %15 = vector.broadcast %13 : vector<2x1x2xf32> to vector<2x2x2xf32>
    %16 = vector.broadcast %14 : vector<1x2x2xf32> to vector<2x2x2xf32>
    %17 = arith.mulf %15, %16 : vector<2x2x2xf32>
    %cst = arith.constant dense<0.000000e+00> : vector<2x2xf32>
    %18 = vector.multi_reduction <add>, %17, %cst [2] : vector<2x2x2xf32> to vector<2x2xf32>
    %19 = arith.addf %18, %5 : vector<2x2xf32>
    %20 = vector.shape_cast %19 : vector<2x2xf32> to vector<2x2x1xf32>
    %21 = vector.shape_cast %19 : vector<2x2xf32> to vector<1x2x2xf32>
    %22 = vector.broadcast %20 : vector<2x2x1xf32> to vector<2x2x2xf32>
    %23 = vector.broadcast %21 : vector<1x2x2xf32> to vector<2x2x2xf32>
    %24 = arith.mulf %22, %23 : vector<2x2x2xf32>
    %cst_7 = arith.constant dense<0.000000e+00> : vector<2x2xf32>
    %25 = vector.multi_reduction <add>, %24, %cst_7 [1] : vector<2x2x2xf32> to vector<2x2xf32>
    %26 = vector.broadcast %10 : vector<1x2xf32> to vector<2x2xf32>
    %27 = arith.addf %25, %26 : vector<2x2xf32>
    %28 = math.tanh %27 : vector<2x2xf32>
    %c0_8 = arith.constant 0 : index
    %c0_9 = arith.constant 0 : index
    %c0_10 = arith.constant 0 : index
    %29 = vector.load %arg3[%c0_8, %c0_9, %c0_10] : memref<1x2x2xf32, #tpu.memory_space<vmem>>, vector<1x2x2xf32>
    %30 = vector.shape_cast %29 : vector<1x2x2xf32> to vector<2x2xf32>
    %31 = vector.shape_cast %28 : vector<2x2xf32> to vector<1x2x2xf32>
    tpu.vector_store %arg3[%c0_8, %c0_9, %c0_10], %31 {strides = array<i32>} : memref<1x2x2xf32, #tpu.memory_space<vmem>>, vector<1x2x2xf32>,
    return
  }
}

</mosaic_0001>

<bundles_post_ra>
// kernel: tpu_custom_call.1
= control target key start
LH: loop header
LB: loop body
LE: loop exit
PB: predicated region body
PF: predicated region fallthrough
CT: control target
= control target key end

     0   :  { %8 = vsyncpa [#allocation3], 0  ;;  %s332_s0 = inlined_call_operand.hbm [shape: f32[1,2,2], index: 0, kind: input, shape index: {}]   ;;  %s333_s1 = inlined_call_operand.hbm [shape: f32[2,2], index: 1, kind: input, shape index: {}]   ;;  %s334_s2 = inlined_call_operand.vmem [shape: f32[2], index: 2, kind: input, shape index: {}]   ;;  %s335_s3 = inlined_call_operand.hbm [shape: f32[1,2,2], index: 3, kind: output, shape index: {}]  }
   0x1   :  { %9 = vsyncpa [#allocation7], 0 }
   0x2   :  { %10 = vsyncpa [#allocation5], 0 }
   0x3   :  { %11 = vsyncpa [#allocation4], 0  ;;  %s287_s12 = smov [#allocation2]   ;;  %s288_s14 = smov [#allocation6]  }
   0x4   :  { %s18_s13 = sshll.u32 %s287_s12, 4  ;;  %s28_s15 = sshll.u32 %s288_s14, 4  ;;  %s19_s13 = int_to_ptr.vmem [resolvable:$true] %s18_s13  ;;  %s29_s15 = int_to_ptr.vmem [resolvable:$true] %s28_s15 }
   0x5   :  { %s215_s16 = scalar_lea.vmem %s19_s13, 32  ;;  %p220_p1 = scmp.lt.s32.totalorder %s19_s13, %s19_s13 }
   0x6   :  { %p216_p0 = scmp.ne.s32.totalorder %s19_s13, %s215_s16  ;;  %p221_p2 = scmp.lt.s32.totalorder %s215_s16, %s215_s16 }
   0x8   :  { %p222_p3 = por %p221_p2, %p220_p1 }
   0xa   :  { %p223_p4 = pnand %p222_p3, %p216_p0 }
   0xc   :  { %226 = shalt.err (!%p223_p4)
}
   0xd   :  { %21 = dma.hbm_to_vmem [thread:$0]  %s332_s0, 32, %s19_s13, [#allocation3]  }
   0xe   :  { %s235_s19 = scalar_lea.vmem %s29_s15, 32  ;;  %p240_p6 = scmp.lt.s32.totalorder %s29_s15, %s29_s15 }
   0xf   :  { %p236_p5 = scmp.ne.s32.totalorder %s29_s15, %s235_s19  ;;  %p241_p7 = scmp.lt.s32.totalorder %s235_s19, %s235_s19 }
  0x11   :  { %p242_p8 = por %p241_p7, %p240_p6 }
  0x13   :  { %p243_p9 = pnand %p242_p8, %p236_p5 }
  0x15   :  { %246 = shalt.err (!%p243_p9)
}
  0x16   :  { %31 = dma.hbm_to_vmem [thread:$0]  %s333_s1, 32, %s29_s15, [#allocation7]  }
  0x17   :  { %s38_s24 = sshll.u32 %s334_s2, 4  ;;  %s39_s24 = int_to_ptr.vmem [resolvable:$true] %s38_s24 }
  0x18   :  { %s247_s25 = scalar_lea.vmem %s39_s24, 16  ;;  %p252_p11 = scmp.lt.s32.totalorder %s39_s24, %s39_s24 }
  0x19   :  { %p248_p10 = scmp.ne.s32.totalorder %s39_s24, %s247_s25  ;;  %p253_p12 = scmp.lt.s32.totalorder %s247_s25, %s247_s25 }
  0x1b   :  { %p254_p13 = por %p253_p12, %p252_p11 }
  0x1d   :  { %p255_p0 = pnand %p254_p13, %p248_p10 }
  0x1f   :  { %258 = shalt.err (!%p255_p0)
}
  0x20   :  { %s289_s0 = smov [#allocation8]  }
  0x21   :  { %41 = dma.vmem_to_smem %s39_s24, 16, %s289_s0, [#allocation5]  }
  0x22   :  { %279 = dma.done.wait [#allocation3], 32  }
  0x23   :  { %280 = vsyncadd [#allocation3], 4294967264 }
  0x24   :  { %281 = dma.done.wait [#allocation7], 32  }
  0x25   :  { %282 = vsyncadd [#allocation7], 4294967264 }
  0x26   :  { %283 = dma.done.wait [#allocation5], 16  }
  0x27   :  { %284 = vsyncadd [#allocation5], 4294967280 }
  0x28   :  { %51 = sfence }
  0x29   :  { %v74_v0 = vlaneseq  ;;  %s53_s1 = sld [smem:[#allocation8]]  ;;  %v290_v1 = vmov 1966171168   ;;  %vm57_vm0 = vcmask 1040384   ;;  %vm59_vm1 = vcmask 7168   ;;  %s292_s26 = smov [#allocation9]  }
  0x2a   :  { %v72_v2 = vunpack.c.l.s4 %v290_v1  ;;  %s193_s2 = sld [smem:[#allocation8 + $0x1]]  ;;  %v194_v4 = vld.sshfl [vmem:[#allocation6] sm:$0x11 pattern:$0x75316420]  ;;  %vm97_vm2 = vcmask 9216  }
  0x2b   :  { %v75_v3 = vshrl.u32 %v74_v0, 7  ;;  %v70_v6 = vcombine.high %v194_v4, %v194_v4  ;;  %v61_v14 = vld [vmem:[#allocation2] sm:$0x3]  ;;  %v291_v26 = vmov 0   ;;  %v134_v27 = vand.u32 127, %v74_v0  ;;  %s182_s27 = sshll.u32 %s292_s26, 4  ;;  %s183_s27 = int_to_ptr.vmem [resolvable:$true] %s182_s27 }
  0x2c   :  { %v73_v5 = vunpack.c.0.s8 %v72_v2  ;;  %201 = vset.pattern.permute.xlu0 %v291_v26  ;;  %202 = vset.pattern.permute.xlu1 %v291_v26  ;;  %vm143_vm3 = vcmask 1041409   ;;  %s259_s28 = scalar_lea.vmem %s183_s27, 32  ;;  %p264_p2 = scmp.lt.s32.totalorder %s183_s27, %s183_s27 }
  0x2d   :  { %v87_v8 = vsub.s32 0, %v75_v3  ;;  %v114_v13 = vsub.s32 1, %v75_v3  ;;  %v137_v28 = vsub.s32 %v134_v27, %v75_v3  ;;  %p260_p1 = scmp.ne.s32.totalorder %s183_s27, %s259_s28  ;;  %p265_p3 = scmp.lt.s32.totalorder %s259_s28, %s259_s28 }
  0x2e   :  { %v76_v7 = vsub.s32 %v73_v5, %v75_v3 }
  0x2f   :  { %v54_v9 = vstv %s53_s1  ;;  %p266_p4 = por %p265_p3, %p264_p2 }
  0x30   :  { %v77_v10 = vrot.slane %v194_v4, %v76_v7  ;;  %v84_v11 = vrot.slane %v70_v6, %v76_v7  ;;  %v56_v12 = vstv %s193_s2 }
  0x31   :  { %v58_v15 = vsel %vm57_vm0, %v54_v9, %v56_v12  ;;  %v60_v16 = vsel %vm59_vm1, %v54_v9, %v56_v12  ;;  %p267_p5 = pnand %p266_p4, %p260_p1 }
  0x32   :  { %v88_v17 = vrot.slane %v77_v10, %v87_v8  ;;  %v92_v18 = vrot.slane %v84_v11, %v87_v8  ;;  %v108_v19 = vrot.slane %v58_v15, %v87_v8  ;;  %v165_v20 = vrot.slane %v60_v16, %v87_v8 }
  0x33   :  { %v115_v23 = vrot.slane %v58_v15, %v114_v13 }
  0x34   :  { %v95_v21 = vmul.f32 %v88_v17, %v61_v14  ;;  %v96_v22 = vmul.f32 %v92_v18, %v61_v14  ;;  %110 = vbcast.lane.b32.xlu1 %v108_v19, 256 }
  0x36   :  { %v98_v24 = vsel %vm97_vm2, %v95_v21, 0.0  ;;  %v101_v25 = vsel %vm97_vm2, %v96_v22, 0.0 }
  0x37   :  { %99 = vadd.xlane.f32.xlu0 %v98_v24 }
  0x38   :  { %117 = vbcast.lane.b32.xlu1 %v115_v23, 256 }
  0x3b   :  { %102 = vadd.xlane.f32.xlu0 %v101_v25 }
  0xa6   :  { %v111_v29 = vpop.permute.xlu1 %110 }
  0xaa   :  { %v118_v32 = vpop.permute.xlu1 %117 }
  0xc0   :  { %v100_v30 = vpop.xlane.xlu0 %99 }
  0xc1   :  { %v121_v31 = vadd.f32 %v111_v29, %v100_v30 }
  0xc3   :  { %125 = vperm.xlu0 %201, %v121_v31  }
  0xc4   :  { %v103_v33 = vpop.xlane.xlu0 %102 }
  0xc5   :  { %v122_v34 = vadd.f32 %v118_v32, %v103_v33 }
  0xc7   :  { %130 = vperm.xlu1 %202, %v122_v34  }
 0x13e   :  { %v126_v35 = vpop.permute.xlu0 %125 }
 0x13f   :  { %v138_v37 = vrot.slane %v126_v35, %v137_v28 }
 0x142   :  { %v131_v36 = vpop.permute.xlu1 %130 }
 0x143   :  { %v142_v38 = vrot.slane %v131_v36, %v137_v28 }
 0x145   :  { %v144_v39 = vsel %vm143_vm3, %v142_v38, %v138_v37 }
 0x146   :  { %v146_v40 = vmul.f32 %v144_v39, %v126_v35  ;;  %v147_v41 = vmul.f32 %v144_v39, %v131_v36 }
 0x148   :  { %v148_v42 = vsel %vm97_vm2, %v146_v40, 0.0  ;;  %v155_v43 = vsel %vm97_vm2, %v147_v41, 0.0 }
 0x149   :  { %v149_v44 = vrot.slane %v148_v42, 4  ;;  %v156_v45 = vrot.slane %v155_v43, 4 }
 0x14b   :  { %v150_v46 = vadd.f32 %v149_v44, %v148_v42  ;;  %v157_v47 = vadd.f32 %v156_v45, %v155_v43 }
 0x14d   :  { %v151_v48 = vrot.slane %v150_v46, 2  ;;  %v158_v49 = vrot.slane %v157_v47, 2 }
 0x14f   :  { %v152_v50 = vadd.f32 %v151_v48, %v150_v46  ;;  %v159_v51 = vadd.f32 %v158_v49, %v157_v47 }
 0x151   :  { %v153_v52 = vrot.slane %v152_v50, 1  ;;  %v160_v53 = vrot.slane %v159_v51, 1 }
 0x153   :  { %v154_v54 = vadd.f32 %v153_v52, %v152_v50  ;;  %v161_v55 = vadd.f32 %v160_v53, %v159_v51 }
 0x155   :  { %v166_v56 = vadd.f32 %v165_v20, %v154_v54  ;;  %v167_v57 = vadd.f32 %v165_v20, %v161_v55 }
 0x157   :  { %203 = vtanh.f32 %v167_v57 }
 0x158   :  { %205 = vtanh.f32 %v166_v56 }
 0x164   :  { %v204_v58 = vpop.eup %203 }
 0x165   :  { %v172_v59 = vrot.slane %v204_v58, 7  ;;  %v206_v60 = vpop.eup %205 }
 0x167   :  { %v173_v61 = vsel %vm143_vm3, %v172_v59, %v206_v60 }
 0x168   :  { %175 = vst.msk [vmem:[#allocation9] sm:$0x3] %vm97_vm2, %v173_v61 }
 0x169   :  { %270 = shalt.err (!%p267_p5)
}
 0x16a   :  { %185 = dma.vmem_to_hbm [thread:$0]  %s183_s27, 32, %s335_s3, [#allocation4]  }
 0x16b   :  { %285 = dma.done.wait [#allocation4], 32  }
 0x16c   :  { %286 = vsyncadd [#allocation4], 4294967264 }
 0x16d   :  { %189 = vsyncpa [#allocation3], 1 }
 0x16e   :  { %190 = vsyncpa [#allocation7], 1 }
 0x16f   :  { %191 = vsyncpa [#allocation4], 1 }
 0x170   :  { %192 = vsyncpa [#allocation5], 1 }

</bundles_post_ra>
